<compile_context>
chip_gen: v5e
topology: v5e:2x2
jax: 0.10.0
libtpu: 0.0.40
codegen_flags: <defaults>
</compile_context>

<pallas_src>
import math
import jax
import jax.numpy as jnp
from jax.experimental import pallas as pl
from jax.experimental.pallas import tpu as pltpu


def _round_up(a, b):
    return ((a + b - 1) // b) * b


def _epilogue(acc_f32, x_f32, b2_f32, gamma_f32, beta_f32):
    """bias2 + residual + LayerNorm, all in f32."""
    y = acc_f32 + b2_f32 + x_f32
    mean = jnp.mean(y, axis=-1, keepdims=True)
    var = jnp.mean((y - mean) ** 2, axis=-1, keepdims=True)
    y_norm = (y - mean) * jax.lax.rsqrt(var + 1e-5)
    return y_norm * gamma_f32 + beta_f32


def ff_single_kernel(x_ref, w1_ref, b1_ref, w2_ref, b2_ref,
                     gamma_ref, beta_ref, o_ref):
    # Whole hidden dim in one tile: no scratch, no reduction axis.
    h = jnp.dot(x_ref[...], w1_ref[...], preferred_element_type=jnp.float32)
    h = jnp.maximum(h + b1_ref[...].astype(jnp.float32), 0.0)
    acc = jnp.dot(h.astype(w2_ref.dtype), w2_ref[...],
                  preferred_element_type=jnp.float32)
    out = _epilogue(acc,
                    x_ref[...].astype(jnp.float32),
                    b2_ref[...].astype(jnp.float32),
                    gamma_ref[...].astype(jnp.float32),
                    beta_ref[...].astype(jnp.float32))
    o_ref[...] = out.astype(o_ref.dtype)


def ff_streaming_kernel(x_ref, w1_ref, b1_ref, w2_ref, b2_ref,
                        gamma_ref, beta_ref, o_ref, acc_ref):
    # x_ref:    (tm, E)          resident across the H axis (same row tile)
    # w1_ref:   (E, tH)  b1_ref: (1, tH)   -- j-th hidden slice
    # w2_ref:   (tH, E)  b2_ref: (1, E)
    # gamma/beta: (1, E)
    # acc_ref:  (tm, E) f32 scratch accumulator
    j = pl.program_id(1)
    nj = pl.num_programs(1)

    # fc1 slice + ReLU: (tm, E) @ (E, tH) -> (tm, tH), f32 accumulation on MXU.
    h = jnp.dot(x_ref[...], w1_ref[...], preferred_element_type=jnp.float32)
    h = jnp.maximum(h + b1_ref[...].astype(jnp.float32), 0.0)

    # fc2 partial: (tm, tH) @ (tH, E).
    partial = jnp.dot(h.astype(w2_ref.dtype), w2_ref[...],
                      preferred_element_type=jnp.float32)

    # First H step overwrites (avoids a separate zero-init + read of zeros).
    @pl.when(j == 0)
    def _():
        acc_ref[...] = partial

    @pl.when(j > 0)
    def _():
        acc_ref[...] += partial

    # Epilogue only on the last hidden slice.
    @pl.when(j == nj - 1)
    def _():
        out = _epilogue(acc_ref[...],
                        x_ref[...].astype(jnp.float32),
                        b2_ref[...].astype(jnp.float32),
                        gamma_ref[...].astype(jnp.float32),
                        beta_ref[...].astype(jnp.float32))
        o_ref[...] = out.astype(o_ref.dtype)


def feedforward(x, w1, b1, w2, b2, gamma, beta, *, tm=512, th=512):
    """x: (batch, seq, embed).  w1: (E, H), w2: (H, E) (already transposed)."""
    B, S, E = x.shape
    H = w1.shape[1]
    rows = B * S

    # Row tile: as large as requested, shrunk for tiny inputs, padded otherwise.
    tm_eff = min(tm, _round_up(rows, 8))
    rows_p = _round_up(rows, tm_eff)

    # Hidden tile: stream weight slices along H (reduction axis, last in grid).
    th_eff = min(th, H)
    assert H % th_eff == 0, "ff_hidden_size must be divisible by the hidden tile"
    if th_eff != H:
        assert th_eff % 128 == 0, "hidden tile must be lane-dense (multiple of 128)"

    x2 = x.reshape(rows, E)
    if rows_p != rows:
        x2 = jnp.pad(x2, ((0, rows_p - rows), (0, 0)))
    b1_2 = b1.reshape(1, H)
    b2_2 = b2.reshape(1, E)
    g_2 = gamma.reshape(1, E)
    be_2 = beta.reshape(1, E)

    n_row_tiles = rows_p // tm_eff
    n_h_tiles = H // th_eff

    itemsize = jnp.dtype(x.dtype).itemsize
    cost = pl.CostEstimate(
        flops=4 * rows_p * E * H,                       # two matmuls, 2 flops/MAC
        transcendentals=rows_p,                         # rsqrt per row
        bytes_accessed=(2 * rows_p * E * itemsize       # x in + out
                        + 2 * E * H * jnp.dtype(w1.dtype).itemsize  # w1 + w2
                        + (H + 3 * E) * 4),             # biases / gamma / beta
    )
    compiler_params = pltpu.CompilerParams(
        dimension_semantics=(("parallel",) if n_h_tiles == 1
                             else ("parallel", "arbitrary")),
        vmem_limit_bytes=48 * 1024 * 1024,
    )

    if n_h_tiles == 1:
        # Single-pass path: whole H resident, no scratch accumulator.
        grid_spec = pltpu.PrefetchScalarGridSpec(
            num_scalar_prefetch=0,
            grid=(n_row_tiles,),
            in_specs=[
                pl.BlockSpec((tm_eff, E), lambda i: (i, 0)),   # x rows
                pl.BlockSpec((E, H), lambda i: (0, 0)),        # w1
                pl.BlockSpec((1, H), lambda i: (0, 0)),        # b1
                pl.BlockSpec((H, E), lambda i: (0, 0)),        # w2
                pl.BlockSpec((1, E), lambda i: (0, 0)),        # b2
                pl.BlockSpec((1, E), lambda i: (0, 0)),        # gamma
                pl.BlockSpec((1, E), lambda i: (0, 0)),        # beta
            ],
            out_specs=pl.BlockSpec((tm_eff, E), lambda i: (i, 0)),
        )
        kernel = ff_single_kernel
    else:
        # Streaming path: H is the last ("arbitrary") reduction grid axis.
        grid_spec = pltpu.PrefetchScalarGridSpec(
            num_scalar_prefetch=0,
            grid=(n_row_tiles, n_h_tiles),
            in_specs=[
                pl.BlockSpec((tm_eff, E), lambda i, j: (i, 0)),   # x rows (resident over j)
                pl.BlockSpec((E, th_eff), lambda i, j: (0, j)),   # w1 slice
                pl.BlockSpec((1, th_eff), lambda i, j: (0, j)),   # b1 slice
                pl.BlockSpec((th_eff, E), lambda i, j: (j, 0)),   # w2 slice
                pl.BlockSpec((1, E), lambda i, j: (0, 0)),        # b2
                pl.BlockSpec((1, E), lambda i, j: (0, 0)),        # gamma
                pl.BlockSpec((1, E), lambda i, j: (0, 0)),        # beta
            ],
            out_specs=pl.BlockSpec((tm_eff, E), lambda i, j: (i, 0)),
            scratch_shapes=[pltpu.VMEM((tm_eff, E), jnp.float32)],
        )
        kernel = ff_streaming_kernel

    out = pl.pallas_call(
        kernel,
        out_shape=jax.ShapeDtypeStruct((rows_p, E), x.dtype),
        grid_spec=grid_spec,
        compiler_params=compiler_params,
        cost_estimate=cost,
    )(x2, w1, b1_2, w2, b2_2, g_2, be_2)

    return out[:rows].reshape(B, S, E)


def reference(x, w1, b1, w2, b2, gamma, beta):
    h = jnp.maximum(x @ w1 + b1, 0.0)
    y = h @ w2 + b2
    y = y + x
    mean = jnp.mean(y, axis=-1, keepdims=True)
    var = jnp.mean((y - mean) ** 2, axis=-1, keepdims=True)
    return (y - mean) * jax.lax.rsqrt(var + 1e-5) * gamma + beta


if __name__ == "__main__":
    # Small, lane-dense shapes consistent with a transformer feedforward block.
    batch, seq, embed, ff_hidden = 2, 8, 128, 256

    key = jax.random.PRNGKey(0)
    kx, kw1, kb1, kw2, kb2 = jax.random.split(key, 5)

    x = jax.random.normal(kx, (batch, seq, embed), dtype=jnp.float32)

    # Deterministic init mimicking nn.Linear (uniform +/- 1/sqrt(fan_in)).
    bound1 = 1.0 / math.sqrt(embed)
    w1 = jax.random.uniform(kw1, (embed, ff_hidden), jnp.float32, -bound1, bound1)
    b1 = jax.random.uniform(kb1, (ff_hidden,), jnp.float32, -bound1, bound1)
    bound2 = 1.0 / math.sqrt(ff_hidden)
    w2 = jax.random.uniform(kw2, (ff_hidden, embed), jnp.float32, -bound2, bound2)
    b2 = jax.random.uniform(kb2, (embed,), jnp.float32, -bound2, bound2)
    # nn.LayerNorm default: weight=1, bias=0.
    gamma = jnp.ones((embed,), jnp.float32)
    beta = jnp.zeros((embed,), jnp.float32)

    # Single-pass path (H fits in one tile).
    out = feedforward(x, w1, b1, w2, b2, gamma, beta)
    out = jax.block_until_ready(out)

    ref = reference(x, w1, b1, w2, b2, gamma, beta)
    assert out.shape == (batch, seq, embed)
    assert jnp.allclose(out, ref, atol=1e-4, rtol=1e-4)

    # Also exercise the streaming (H-tiled) path to keep it verified.
    out2 = feedforward(x, w1, b1, w2, b2, gamma, beta, th=128)
    out2 = jax.block_until_ready(out2)
    assert jnp.allclose(out2, ref, atol=1e-4, rtol=1e-4)

    print("KERNEL_OK")
</pallas_src>

<mosaic_0001>
module attributes {stable_mosaic.version = 11 : i64} {
  func.func @ff_single_kernel(%arg0: i32, %arg1: memref<16x128xf32, #tpu.memory_space<vmem>>, %arg2: memref<128x256xf32, #tpu.memory_space<vmem>>, %arg3: memref<1x256xf32, #tpu.memory_space<vmem>>, %arg4: memref<256x128xf32, #tpu.memory_space<vmem>>, %arg5: memref<1x128xf32, #tpu.memory_space<vmem>>, %arg6: memref<1x128xf32, #tpu.memory_space<vmem>>, %arg7: memref<1x128xf32, #tpu.memory_space<vmem>>, %arg8: memref<16x128xf32, #tpu.memory_space<vmem>>) attributes {dimension_semantics = [#tpu.dimension_semantics<parallel>], iteration_bounds = array<i64: 1>, scalar_prefetch = 0 : i64, scratch_operands = 0 : i64, tpu.core_type = #tpu.core_type<tc>, window_params = [{transform_indices = @transform_0, window_bounds = array<i64: 16, 128>}, {pipeline_mode = #tpu.pipeline_mode<synchronous>, transform_indices = @transform_1, window_bounds = array<i64: 128, 256>}, {pipeline_mode = #tpu.pipeline_mode<synchronous>, transform_indices = @transform_2, window_bounds = array<i64: 1, 256>}, {pipeline_mode = #tpu.pipeline_mode<synchronous>, transform_indices = @transform_3, window_bounds = array<i64: 256, 128>}, {pipeline_mode = #tpu.pipeline_mode<synchronous>, transform_indices = @transform_4, window_bounds = array<i64: 1, 128>}, {pipeline_mode = #tpu.pipeline_mode<synchronous>, transform_indices = @transform_5, window_bounds = array<i64: 1, 128>}, {pipeline_mode = #tpu.pipeline_mode<synchronous>, transform_indices = @transform_6, window_bounds = array<i64: 1, 128>}, {transform_indices = @transform_7, window_bounds = array<i64: 16, 128>}]} {
    %c0 = arith.constant 0 : index
    %c0_0 = arith.constant 0 : index
    %0 = vector.load %arg1[%c0, %c0_0] : memref<16x128xf32, #tpu.memory_space<vmem>>, vector<16x128xf32>
    %c0_1 = arith.constant 0 : index
    %c0_2 = arith.constant 0 : index
    %1 = vector.load %arg2[%c0_1, %c0_2] : memref<128x256xf32, #tpu.memory_space<vmem>>, vector<128x256xf32>
    %cst = arith.constant dense<0.000000e+00> : vector<16x256xf32>
    %2 = tpu.matmul %0, %1, %cst {dimension_numbers = #tpu.dot_dimension_numbers<[1], [0], [0], [1], [0, 0, 1, 1], [], []>} : vector<16x128xf32>, vector<128x256xf32>, vector<16x256xf32> -> vector<16x256xf32>
    %c0_3 = arith.constant 0 : index
    %c0_4 = arith.constant 0 : index
    %3 = vector.load %arg3[%c0_3, %c0_4] : memref<1x256xf32, #tpu.memory_space<vmem>>, vector<1x256xf32>
    %4 = vector.broadcast %3 : vector<1x256xf32> to vector<16x256xf32>
    %5 = arith.addf %2, %4 : vector<16x256xf32>
    %cst_5 = arith.constant 0.000000e+00 : f32
    %6 = vector.broadcast %cst_5 : f32 to vector<16x256xf32>
    %7 = arith.maximumf %5, %6 : vector<16x256xf32>
    %c0_6 = arith.constant 0 : index
    %c0_7 = arith.constant 0 : index
    %8 = vector.load %arg4[%c0_6, %c0_7] : memref<256x128xf32, #tpu.memory_space<vmem>>, vector<256x128xf32>
    %cst_8 = arith.constant dense<0.000000e+00> : vector<16x128xf32>
    %9 = tpu.matmul %7, %8, %cst_8 {dimension_numbers = #tpu.dot_dimension_numbers<[1], [0], [0], [1], [0, 0, 1, 1], [], []>} : vector<16x256xf32>, vector<256x128xf32>, vector<16x128xf32> -> vector<16x128xf32>
    %c0_9 = arith.constant 0 : index
    %c0_10 = arith.constant 0 : index
    %10 = vector.load %arg1[%c0_9, %c0_10] : memref<16x128xf32, #tpu.memory_space<vmem>>, vector<16x128xf32>
    %c0_11 = arith.constant 0 : index
    %c0_12 = arith.constant 0 : index
    %11 = vector.load %arg5[%c0_11, %c0_12] : memref<1x128xf32, #tpu.memory_space<vmem>>, vector<1x128xf32>
    %c0_13 = arith.constant 0 : index
    %c0_14 = arith.constant 0 : index
    %12 = vector.load %arg6[%c0_13, %c0_14] : memref<1x128xf32, #tpu.memory_space<vmem>>, vector<1x128xf32>
    %c0_15 = arith.constant 0 : index
    %c0_16 = arith.constant 0 : index
    %13 = vector.load %arg7[%c0_15, %c0_16] : memref<1x128xf32, #tpu.memory_space<vmem>>, vector<1x128xf32>
    %14 = vector.broadcast %11 : vector<1x128xf32> to vector<16x128xf32>
    %15 = arith.addf %9, %14 : vector<16x128xf32>
    %16 = arith.addf %15, %10 : vector<16x128xf32>
    %cst_17 = arith.constant dense<0.000000e+00> : vector<16xf32>
    %17 = vector.multi_reduction <add>, %16, %cst_17 [1] : vector<16x128xf32> to vector<16xf32>
    %18 = vector.shape_cast %17 : vector<16xf32> to vector<16x1xf32>
    %cst_18 = arith.constant 1.280000e+02 : f32
    %19 = vector.broadcast %cst_18 : f32 to vector<16x1xf32>
    %20 = arith.divf %18, %19 : vector<16x1xf32>
    %21 = vector.broadcast %20 : vector<16x1xf32> to vector<16x128xf32>
    %22 = arith.subf %16, %21 : vector<16x128xf32>
    %23 = arith.mulf %22, %22 : vector<16x128xf32>
    %cst_19 = arith.constant dense<0.000000e+00> : vector<16xf32>
    %24 = vector.multi_reduction <add>, %23, %cst_19 [1] : vector<16x128xf32> to vector<16xf32>
    %25 = vector.shape_cast %24 : vector<16xf32> to vector<16x1xf32>
    %cst_20 = arith.constant 1.280000e+02 : f32
    %26 = vector.broadcast %cst_20 : f32 to vector<16x1xf32>
    %27 = arith.divf %25, %26 : vector<16x1xf32>
    %28 = vector.broadcast %20 : vector<16x1xf32> to vector<16x128xf32>
    %29 = arith.subf %16, %28 : vector<16x128xf32>
    %cst_21 = arith.constant 9.99999974E-6 : f32
    %30 = vector.broadcast %cst_21 : f32 to vector<16x1xf32>
    %31 = arith.addf %27, %30 : vector<16x1xf32>
    %32 = math.rsqrt %31 : vector<16x1xf32>
    %33 = vector.broadcast %32 : vector<16x1xf32> to vector<16x128xf32>
    %34 = arith.mulf %29, %33 : vector<16x128xf32>
    %35 = vector.broadcast %12 : vector<1x128xf32> to vector<16x128xf32>
    %36 = arith.mulf %34, %35 : vector<16x128xf32>
    %37 = vector.broadcast %13 : vector<1x128xf32> to vector<16x128xf32>
    %38 = arith.addf %36, %37 : vector<16x128xf32>
    %c0_22 = arith.constant 0 : index
    %c0_23 = arith.constant 0 : index
    %39 = vector.load %arg8[%c0_22, %c0_23] : memref<16x128xf32, #tpu.memory_space<vmem>>, vector<16x128xf32>
    tpu.vector_store %arg8[%c0_22, %c0_23], %38 {strides = array<i32>} : memref<16x128xf32, #tpu.memory_space<vmem>>, vector<16x128xf32>,
    return
  }
  func.func @transform_0(%arg0: i32) -> (i32, i32) {
    %c0_i32 = arith.constant 0 : i32
    %c0_i32_0 = arith.constant 0 : i32
    return %arg0, %c0_i32 : i32, i32
  }
  func.func @transform_1(%arg0: i32) -> (i32, i32) {
    %c0_i32 = arith.constant 0 : i32
    %c0_i32_0 = arith.constant 0 : i32
    %c0_i32_1 = arith.constant 0 : i32
    return %c0_i32, %c0_i32_0 : i32, i32
  }
  func.func @transform_2(%arg0: i32) -> (i32, i32) {
    %c0_i32 = arith.constant 0 : i32
    %c0_i32_0 = arith.constant 0 : i32
    %c0_i32_1 = arith.constant 0 : i32
    return %c0_i32, %c0_i32_0 : i32, i32
  }
  func.func @transform_3(%arg0: i32) -> (i32, i32) {
    %c0_i32 = arith.constant 0 : i32
    %c0_i32_0 = arith.constant 0 : i32
    %c0_i32_1 = arith.constant 0 : i32
    return %c0_i32, %c0_i32_0 : i32, i32
  }
  func.func @transform_4(%arg0: i32) -> (i32, i32) {
    %c0_i32 = arith.constant 0 : i32
    %c0_i32_0 = arith.constant 0 : i32
    %c0_i32_1 = arith.constant 0 : i32
    return %c0_i32, %c0_i32_0 : i32, i32
  }
  func.func @transform_5(%arg0: i32) -> (i32, i32) {
    %c0_i32 = arith.constant 0 : i32
    %c0_i32_0 = arith.constant 0 : i32
    %c0_i32_1 = arith.constant 0 : i32
    return %c0_i32, %c0_i32_0 : i32, i32
  }
  func.func @transform_6(%arg0: i32) -> (i32, i32) {
    %c0_i32 = arith.constant 0 : i32
    %c0_i32_0 = arith.constant 0 : i32
    %c0_i32_1 = arith.constant 0 : i32
    return %c0_i32, %c0_i32_0 : i32, i32
  }
  func.func @transform_7(%arg0: i32) -> (i32, i32) {
    %c0_i32 = arith.constant 0 : i32
    %c0_i32_0 = arith.constant 0 : i32
    return %arg0, %c0_i32 : i32, i32
  }
}

</mosaic_0001>

<bundles_post_ra>
// kernel: tpu_custom_call.1
= control target key start
LH: loop header
LB: loop body
LE: loop exit
PB: predicated region body
PF: predicated region fallthrough
CT: control target
= control target key end

     0   :  { %12 = vsyncpa [#allocation3], 0  ;;  %s574_s0 = inlined_call_operand.hbm [shape: f32[16,128], index: 0, kind: input, shape index: {}]   ;;  %s575_s1 = inlined_call_operand.hbm [shape: f32[128,256], index: 1, kind: input, shape index: {}]   ;;  %s576_s2 = inlined_call_operand.hbm [shape: f32[1,256], index: 2, kind: input, shape index: {}]   ;;  %s577_s3 = inlined_call_operand.hbm [shape: f32[256,128], index: 3, kind: input, shape index: {}]   ;;  %s578_s4 = inlined_call_operand.vmem [shape: f32[1,128], index: 4, kind: input, shape index: {}]   ;;  %s579_s5 = inlined_call_operand.vmem [shape: f32[1,128], index: 5, kind: input, shape index: {}]   ;;  %s580_s6 = inlined_call_operand.vmem [shape: f32[1,128], index: 6, kind: input, shape index: {}]   ;;  %s581_s7 = inlined_call_operand.hbm [shape: f32[16,128], index: 7, kind: output, shape index: {}]  }
   0x1   :  { %13 = vsyncpa [#allocation6], 0 }
   0x2   :  { %14 = vsyncpa [#allocation9], 0  ;;  %s33_s26 = sshll.u32 %s575_s1, 4  ;;  %s34_s26 = int_to_ptr.hbm [resolvable:$true] %s33_s26 }
   0x3   :  { %15 = vsyncpa [#allocation4], 0  ;;  %s491_s27 = smov [#allocation5]   ;;  %s20_s8 = sshll.u32 %s574_s0, 4  ;;  %s21_s8 = int_to_ptr.hbm [resolvable:$true] %s20_s8 }
   0x4   :  { %s35_s28 = sshll.u32 %s491_s27, 4  ;;  %s492_s9 = smov 256   ;;  %s36_s28 = int_to_ptr.vmem [resolvable:$true] %s35_s28 }
   0x5   :  { %s493_s10 = smov 16   ;;  %s494_s11 = smov [#allocation2]  }
   0x6   :  { %41 = dma.hbm_to_vmem [thread:$0]  %s34_s26, 4096, %s36_s28, [#allocation6], %s492_s9, %s492_s9, %s493_s10  }
   0x7   :  { %s22_s12 = sshll.u32 %s494_s11, 4  ;;  %s495_s13 = smov 128   ;;  %s23_s12 = int_to_ptr.vmem [resolvable:$true] %s22_s12 }
   0x8   :  { %s496_s14 = smov 8   ;;  %s47_s16 = sshll.u32 %s576_s2, 4  ;;  %s48_s16 = int_to_ptr.hbm [resolvable:$true] %s47_s16 }
   0x9   :  { %28 = dma.hbm_to_vmem [thread:$0]  %s21_s8, 256, %s23_s12, [#allocation3], %s495_s13, %s495_s13, %s496_s14  }
   0xa   :  { %s497_s17 = smov [#allocation7]   ;;  %s57_s20 = sshll.u32 %s577_s3, 4  ;;  %s58_s20 = int_to_ptr.hbm [resolvable:$true] %s57_s20 }
   0xb   :  { %s49_s0 = sshll.u32 %s497_s17, 4  ;;  %s498_s21 = smov [#allocation8]   ;;  %s50_s0 = int_to_ptr.vmem [resolvable:$true] %s49_s0 }
   0xc   :  { %52 = dma.hbm_to_vmem [thread:$0]  %s48_s16, 32, %s50_s0, [#allocation6]  }
   0xd   :  { %s59_s22 = sshll.u32 %s498_s21, 4  ;;  %s60_s22 = int_to_ptr.vmem [resolvable:$true] %s59_s22 }
   0xe   :  { %65 = dma.hbm_to_vmem [thread:$0]  %s58_s20, 4096, %s60_s22, [#allocation9], %s495_s13, %s495_s13, %s496_s14  }
   0xf   :  { %483 = dma.done.wait [#allocation3], 256  }
  0x10   :  { %484 = vsyncadd [#allocation3], 4294967040 }
  0x11   :  { %485 = dma.done.wait [#allocation6], 4128  }
  0x12   :  { %486 = vsyncadd [#allocation6], 4294963168 }
  0x13   :  { %487 = dma.done.wait [#allocation9], 4096  }
  0x14   :  { %488 = vsyncadd [#allocation9], 4294963200  ;;  %v120_v0 = vld [vmem:[#allocation5 + $0xf0] sm:$0xff]  ;;  %v118_v1 = vld [vmem:[#allocation5 + $0xe0] sm:$0xff]  ;;  %s500_s26 = smov [#allocation10]   ;;  %s329_s29 = sshll.u32 %s581_s7, 4  ;;  %s330_s29 = int_to_ptr.hbm [resolvable:$true] %s329_s29 }
  0x15   :  { %v121_v2 = vld [vmem:[#allocation5 + $0xf8] sm:$0xff]  ;;  %128 = vmatpush.msra.mxu0 %v120_v0  ;;  %v119_v3 = vld [vmem:[#allocation5 + $0xe8] sm:$0xff]  ;;  %v116_v4 = vld [vmem:[#allocation5 + $0xd0] sm:$0xff] }
  0x16   :  { %151 = vmatpush.msra.mxu1 %v121_v2  ;;  %v117_v5 = vld [vmem:[#allocation5 + $0xd8] sm:$0xff]  ;;  %v114_v6 = vld [vmem:[#allocation5 + $0xc0] sm:$0xff]  ;;  %v115_v7 = vld [vmem:[#allocation5 + $0xc8] sm:$0xff] }
  0x17   :  { %129 = vmatpush.msra.mxu0 %v118_v1  ;;  %v112_v8 = vld [vmem:[#allocation5 + $0xb0] sm:$0xff]  ;;  %v113_v9 = vld [vmem:[#allocation5 + $0xb8] sm:$0xff]  ;;  %v110_v10 = vld [vmem:[#allocation5 + $0xa0] sm:$0xff] }
  0x18   :  { %152 = vmatpush.msra.mxu1 %v119_v3  ;;  %v111_v11 = vld [vmem:[#allocation5 + $0xa8] sm:$0xff]  ;;  %v108_v12 = vld [vmem:[#allocation5 + $0x90] sm:$0xff]  ;;  %v109_v13 = vld [vmem:[#allocation5 + $0x98] sm:$0xff] }
  0x19   :  { %130 = vmatpush.msra.mxu0 %v116_v4  ;;  %v193_v14 = vld [vmem:[#allocation8 + $0x78] sm:$0xff]  ;;  %v192_v15 = vld [vmem:[#allocation8 + $0x70] sm:$0xff]  ;;  %v107_v17 = vld [vmem:[#allocation5 + $0x88] sm:$0xff] }
  0x1a   :  { %153 = vmatpush.msra.mxu1 %v117_v5  ;;  %v106_v16 = vld [vmem:[#allocation5 + $0x80] sm:$0xff]  ;;  %216 = vmatpush.msra.mxu2 %v193_v14  ;;  %v191_v19 = vld [vmem:[#allocation8 + $0x68] sm:$0xff]  ;;  %v208_v20 = vld [vmem:[#allocation8 + $0xf0] sm:$0xff] }
  0x1b   :  { %131 = vmatpush.msra.mxu0 %v114_v6  ;;  %v209_v18 = vld [vmem:[#allocation8 + $0xf8] sm:$0xff]  ;;  %v104_v21 = vld [vmem:[#allocation5 + $0x70] sm:$0xff]  ;;  %v190_v23 = vld [vmem:[#allocation8 + $0x60] sm:$0xff] }
  0x1c   :  { %154 = vmatpush.msra.mxu1 %v115_v7  ;;  %v105_v22 = vld [vmem:[#allocation5 + $0x78] sm:$0xff]  ;;  %217 = vmatpush.msra.mxu2 %v192_v15  ;;  %v207_v24 = vld [vmem:[#allocation8 + $0xe8] sm:$0xff]  ;;  %v102_v25 = vld [vmem:[#allocation5 + $0x60] sm:$0xff] }
  0x1d   :  { %132 = vmatpush.msra.mxu0 %v112_v8  ;;  %239 = vmatpush.msra.mxu3 %v209_v18  ;;  %v103_v26 = vld [vmem:[#allocation5 + $0x68] sm:$0xff]  ;;  %v189_v27 = vld [vmem:[#allocation8 + $0x58] sm:$0xff]  ;;  %v100_v29 = vld [vmem:[#allocation5 + $0x50] sm:$0xff] }
  0x1e   :  { %155 = vmatpush.msra.mxu1 %v113_v9  ;;  %218 = vmatpush.msra.mxu2 %v191_v19  ;;  %v206_v28 = vld [vmem:[#allocation8 + $0xe0] sm:$0xff]  ;;  %v101_v30 = vld [vmem:[#allocation5 + $0x58] sm:$0xff]  ;;  %v187_v35 = vld [vmem:[#allocation8 + $0x48] sm:$0xff] }
  0x1f   :  { %133 = vmatpush.msra.mxu0 %v110_v10  ;;  %240 = vmatpush.msra.mxu3 %v208_v20  ;;  %v98_v31 = vld [vmem:[#allocation5 + $0x40] sm:$0xff]  ;;  %v188_v32 = vld [vmem:[#allocation8 + $0x50] sm:$0xff]  ;;  %v99_v34 = vld [vmem:[#allocation5 + $0x48] sm:$0xff] }
  0x20   :  { %156 = vmatpush.msra.mxu1 %v111_v11  ;;  %219 = vmatpush.msra.mxu2 %v190_v23  ;;  %v205_v33 = vld [vmem:[#allocation8 + $0xd8] sm:$0xff]  ;;  %v204_v36 = vld [vmem:[#allocation8 + $0xd0] sm:$0xff]  ;;  %v186_v39 = vld [vmem:[#allocation8 + $0x40] sm:$0xff] }
  0x21   :  { %134 = vmatpush.msra.mxu0 %v108_v12  ;;  %241 = vmatpush.msra.mxu3 %v207_v24  ;;  %v96_v37 = vld [vmem:[#allocation5 + $0x30] sm:$0xff]  ;;  %v97_v38 = vld [vmem:[#allocation5 + $0x38] sm:$0xff]  ;;  %v94_v41 = vld [vmem:[#allocation5 + $0x20] sm:$0xff] }
  0x22   :  { %157 = vmatpush.msra.mxu1 %v109_v13  ;;  %220 = vmatpush.msra.mxu2 %v189_v27  ;;  %v203_v40 = vld [vmem:[#allocation8 + $0xc8] sm:$0xff]  ;;  %v185_v43 = vld [vmem:[#allocation8 + $0x38] sm:$0xff]  ;;  %v202_v44 = vld [vmem:[#allocation8 + $0xc0] sm:$0xff] }
  0x23   :  { %135 = vmatpush.msra.mxu0 %v106_v16  ;;  %242 = vmatpush.msra.mxu3 %v206_v28  ;;  %v95_v42 = vld [vmem:[#allocation5 + $0x28] sm:$0xff]  ;;  %v92_v45 = vld [vmem:[#allocation5 + $0x10] sm:$0xff]  ;;  %v93_v46 = vld [vmem:[#allocation5 + $0x18] sm:$0xff]  ;;  %v499_v28 = vmov 128.0  }
  0x24   :  { %158 = vmatpush.msra.mxu1 %v107_v17  ;;  %221 = vmatpush.msra.mxu2 %v188_v32  ;;  %v184_v47 = vld [vmem:[#allocation8 + $0x30] sm:$0xff]  ;;  %v201_v48 = vld [vmem:[#allocation8 + $0xb8] sm:$0xff]  ;;  %v91_v50 = vld [vmem:[#allocation5 + $0x8] sm:$0xff]  ;;  %357 = vrcp.f32 %v499_v28 }
  0x25   :  { %136 = vmatpush.msra.mxu0 %v104_v21  ;;  %243 = vmatpush.msra.mxu3 %v205_v33  ;;  %v90_v49 = vld [vmem:[#allocation5] sm:$0xff]  ;;  %v88_v51 = vld [vmem:[#allocation2] sm:$0xff]  ;;  %v89_v58 = vld [vmem:[#allocation2 + $0x8] sm:$0xff] }
  0x26   :  { %159 = vmatpush.msra.mxu1 %v105_v22  ;;  %222 = vmatpush.msra.mxu2 %v187_v35  ;;  %v183_v52 = vld [vmem:[#allocation8 + $0x28] sm:$0xff]  ;;  %v200_v53 = vld [vmem:[#allocation8 + $0xb0] sm:$0xff]  ;;  %v182_v54 = vld [vmem:[#allocation8 + $0x20] sm:$0xff] }
  0x27   :  { %137 = vmatpush.msra.mxu0 %v102_v25  ;;  %244 = vmatpush.msra.mxu3 %v204_v36  ;;  %v199_v55 = vld [vmem:[#allocation8 + $0xa8] sm:$0xff]  ;;  %v181_v56 = vld [vmem:[#allocation8 + $0x18] sm:$0xff]  ;;  %v198_v57 = vld [vmem:[#allocation8 + $0xa0] sm:$0xff] }
  0x28   :  { %160 = vmatpush.msra.mxu1 %v103_v26  ;;  %223 = vmatpush.msra.mxu2 %v186_v39  ;;  %v180_v59 = vld [vmem:[#allocation8 + $0x10] sm:$0xff]  ;;  %v197_v60 = vld [vmem:[#allocation8 + $0x98] sm:$0xff]  ;;  %v179_v61 = vld [vmem:[#allocation8 + $0x8] sm:$0xff] }
  0x29   :  { %138 = vmatpush.msra.mxu0 %v100_v29  ;;  %245 = vmatpush.msra.mxu3 %v203_v40  ;;  %v196_v62 = vld [vmem:[#allocation8 + $0x90] sm:$0xff]  ;;  %v178_v63 = vld [vmem:[#allocation8] sm:$0xff]  ;;  %v195_v0 = vld [vmem:[#allocation8 + $0x88] sm:$0xff] }
  0x2a   :  { %161 = vmatpush.msra.mxu1 %v101_v30  ;;  %224 = vmatpush.msra.mxu2 %v185_v43  ;;  %v194_v1 = vld [vmem:[#allocation8 + $0x80] sm:$0xff]  ;;  %v122_v2 = vld [vmem:[#allocation7] sm:$0x3]  ;;  %v354_v17 = vld [vmem:[%s578_s4] ss:$0 sm:$0xff]  ;;  %v358_v29 = vpop.eup %357 }
  0x2b   :  { %139 = vmatpush.msra.mxu0 %v98_v31  ;;  %246 = vmatpush.msra.mxu3 %v202_v44  ;;  %v124_v3 = vperm.slane %v122_v2, 0  ;;  %v125_v4 = vperm.slane %v122_v2, 1  ;;  %v269_v30 = vmul.f32 128.0, %v358_v29  ;;  %vm273_vm0 = vweird.f32 %v358_v29 }
  0x2c   :  { %162 = vmatpush.msra.mxu1 %v99_v34  ;;  %225 = vmatpush.msra.mxu2 %v184_v47 }
  0x2d   :  { %140 = vmatpush.msra.mxu0 %v96_v37  ;;  %247 = vmatpush.msra.mxu3 %v201_v48  ;;  %v270_v31 = vsub.f32 1.0, %v269_v30 }
  0x2e   :  { %163 = vmatpush.msra.mxu1 %v97_v38  ;;  %226 = vmatpush.msra.mxu2 %v183_v52 }
  0x2f   :  { %141 = vmatpush.msra.mxu0 %v94_v41  ;;  %248 = vmatpush.msra.mxu3 %v200_v53  ;;  %v271_v32 = vmul.f32 %v358_v29, %v270_v31 }
  0x30   :  { %164 = vmatpush.msra.mxu1 %v95_v42  ;;  %227 = vmatpush.msra.mxu2 %v182_v54 }
  0x31   :  { %142 = vmatpush.msra.mxu0 %v92_v45  ;;  %249 = vmatpush.msra.mxu3 %v199_v55  ;;  %v272_v33 = vadd.f32 %v358_v29, %v271_v32 }
  0x32   :  { %165 = vmatpush.msra.mxu1 %v93_v46  ;;  %228 = vmatpush.msra.mxu2 %v181_v56 }
  0x33   :  { %143 = vmatpush.msra.mxu0 %v90_v49  ;;  %250 = vmatpush.msra.mxu3 %v198_v57  ;;  %v274_v34 = vsel %vm273_vm0, %v358_v29, %v272_v33  ;;  %v355_v57 = vld [vmem:[%s579_s5] ss:$0 sm:$0xff]  ;;  %s327_s5 = sshll.u32 %s500_s26, 4  ;;  %s328_s5 = int_to_ptr.vmem [resolvable:$true] %s327_s5 }
  0x34   :  { %166 = vmatpush.msra.mxu1 %v91_v50  ;;  %144 = vmatmul.f32.vlgmr.msra.gmra.mxu0 %v88_v51 }
  0x35   :  { %167 = vmatmul.f32.vlgmr.msra.gmra.mxu1 %v88_v51  ;;  %229 = vmatpush.msra.mxu2 %v180_v59 }
  0x36   :  { %251 = vmatpush.msra.mxu3 %v197_v60 }
  0x37   :  { %230 = vmatpush.msra.mxu2 %v179_v61  ;;  %v356_v61 = vld [vmem:[%s580_s6] ss:$0 sm:$0xff] }
  0x38   :  { %252 = vmatpush.msra.mxu3 %v196_v62 }
  0x39   :  { %231 = vmatpush.msra.mxu2 %v178_v63 }
  0x3a   :  { %253 = vmatpush.msra.mxu3 %v195_v0 }
  0x3c   :  { %147 = vmatmul.f32.gmra.mxu0 %v89_v58  ;;  %254 = vmatpush.msra.mxu3 %v194_v1 }
  0x3d   :  { %170 = vmatmul.f32.gmra.mxu1 %v89_v58 }
  0xb1   :  { %v145_v5 = vpop.f32.mrf.mxu0 }
  0xb2   :  { %v168_v6 = vpop.f32.mrf.mxu1  ;;  %v146_v7 = vadd.f32 %v145_v5, %v124_v3 }
  0xb3   :  { %v169_v8 = vadd.f32 %v168_v6, %v125_v4 }
  0xb4   :  { %v174_v9 = vmax.f32 %v146_v7, 0.0 }
  0xb5   :  { %v175_v10 = vmax.f32 %v169_v8, 0.0 }
  0xb6   :  { %232 = vmatmul.f32.vlgmr.msra.gmra.mxu2 %v174_v9 }
  0xb7   :  { %255 = vmatmul.f32.vlgmr.msra.gmra.mxu3 %v175_v10 }
  0xb9   :  { %v148_v11 = vpop.f32.mrf.mxu0 }
  0xba   :  { %v171_v12 = vpop.f32.mrf.mxu1  ;;  %v149_v13 = vadd.f32 %v148_v11, %v124_v3 }
  0xbb   :  { %v172_v14 = vadd.f32 %v171_v12, %v125_v4 }
  0xbc   :  { %v176_v15 = vmax.f32 %v149_v13, 0.0 }
  0xbd   :  { %v177_v16 = vmax.f32 %v172_v14, 0.0 }
  0xbe   :  { %235 = vmatmul.f32.gmra.mxu2 %v176_v15 }
  0xbf   :  { %258 = vmatmul.f32.gmra.mxu3 %v177_v16 }
 0x139   :  { %v233_v18 = vpop.f32.mrf.mxu2 }
 0x13a   :  { %v256_v19 = vpop.f32.mrf.mxu3  ;;  %v234_v20 = vadd.f32 %v354_v17, %v233_v18 }
 0x13c   :  { %v257_v21 = vadd.f32 %v256_v19, %v234_v20 }
 0x13e   :  { %v262_v22 = vadd.f32 %v257_v21, %v88_v51 }
 0x140   :  { %264 = vadd.xlane.f32.xlu0 %v262_v22 }
 0x141   :  { %v236_v23 = vpop.f32.mrf.mxu2 }
 0x142   :  { %v259_v24 = vpop.f32.mrf.mxu3  ;;  %v237_v25 = vadd.f32 %v354_v17, %v236_v23 }
 0x144   :  { %v260_v26 = vadd.f32 %v259_v24, %v237_v25 }
 0x146   :  { %v263_v27 = vadd.f32 %v260_v26, %v89_v58 }
 0x148   :  { %266 = vadd.xlane.f32.xlu0 %v263_v27 }
 0x1b3   :  { %v265_v35 = vpop.xlane.xlu0 %264 }
 0x1b4   :  { %v275_v36 = vmul.f32 %v274_v34, %v265_v35 }
 0x1b6   :  { %v277_v37 = vsub.f32 %v262_v22, %v275_v36 }
 0x1b8   :  { %v279_v38 = vmul.f32 %v277_v37, %v277_v37 }
 0x1ba   :  { %281 = vadd.xlane.f32.xlu1 %v279_v38 }
 0x1bb   :  { %v267_v39 = vpop.xlane.xlu0 %266 }
 0x1bc   :  { %v276_v40 = vmul.f32 %v274_v34, %v267_v39 }
 0x1be   :  { %v278_v41 = vsub.f32 %v263_v27, %v276_v40 }
 0x1c0   :  { %v280_v42 = vmul.f32 %v278_v41, %v278_v41 }
 0x1c2   :  { %283 = vadd.xlane.f32.xlu1 %v280_v42 }
 0x22d   :  { %v282_v43 = vpop.xlane.xlu1 %281 }
 0x22e   :  { %v285_v44 = vmul.f32 %v282_v43, %v274_v34 }
 0x230   :  { %v287_v45 = vadd.f32 1e-05, %v285_v44 }
 0x232   :  { %359 = vrsqrt.f32 %v287_v45  ;;  %vm295_vm2 = vweird.f32 %v287_v45 }
 0x235   :  { %v284_v46 = vpop.xlane.xlu1 %283 }
 0x236   :  { %v286_v47 = vmul.f32 %v284_v46, %v274_v34 }
 0x238   :  { %v360_v48 = vpop.eup %359  ;;  %v288_v49 = vadd.f32 1e-05, %v286_v47 }
 0x239   :  { %v290_v50 = vmul.f32 %v360_v48, %v287_v45  ;;  %vm296_vm1 = vweird.f32 %v360_v48 }
 0x23a   :  { %361 = vrsqrt.f32 %v288_v49  ;;  %vm297_vm3 = vmor %vm295_vm2, %vm296_vm1  ;;  %vm305_vm5 = vweird.f32 %v288_v49 }
 0x23b   :  { %v291_v51 = vmul.f32 %v360_v48, %v290_v50 }
 0x23d   :  { %v292_v52 = vmul.f32 0.5, %v291_v51 }
 0x23f   :  { %v293_v53 = vsub.f32 1.5, %v292_v52 }
 0x240   :  { %v362_v54 = vpop.eup %361 }
 0x241   :  { %v294_v55 = vmul.f32 %v360_v48, %v293_v53  ;;  %v300_v56 = vmul.f32 %v362_v54, %v288_v49  ;;  %vm306_vm4 = vweird.f32 %v362_v54 }
 0x242   :  { %vm307_vm6 = vmor %vm305_vm5, %vm306_vm4 }
 0x243   :  { %v298_v58 = vsel %vm297_vm3, %v360_v48, %v294_v55  ;;  %v301_v59 = vmul.f32 %v362_v54, %v300_v56 }
 0x244   :  { %v309_v60 = vmul.f32 %v298_v58, %v277_v37 }
 0x245   :  { %v302_v62 = vmul.f32 0.5, %v301_v59 }
 0x246   :  { %v314_v63 = vmul.f32 %v355_v57, %v309_v60 }
 0x247   :  { %v303_v0 = vsub.f32 1.5, %v302_v62 }
 0x248   :  { %v319_v1 = vadd.f32 %v356_v61, %v314_v63 }
 0x249   :  { %v304_v2 = vmul.f32 %v362_v54, %v303_v0 }
 0x24a   :  { %321 = vst [vmem:[#allocation10] sm:$0xff] %v319_v1 }
 0x24b   :  { %v308_v3 = vsel %vm307_vm6, %v362_v54, %v304_v2 }
 0x24c   :  { %v310_v4 = vmul.f32 %v308_v3, %v278_v41 }
 0x24e   :  { %v315_v5 = vmul.f32 %v355_v57, %v310_v4 }
 0x250   :  { %v320_v6 = vadd.f32 %v356_v61, %v315_v5 }
 0x252   :  { %322 = vst [vmem:[#allocation10 + $0x8] sm:$0xff] %v320_v6 }
 0x253   :  { %335 = dma.vmem_to_hbm [thread:$0]  %s328_s5, 256, %s330_s29, [#allocation4], %s495_s13, %s495_s13, %s496_s14  }
 0x254   :  { %489 = dma.done.wait [#allocation4], 256  }
 0x255   :  { %490 = vsyncadd [#allocation4], 4294967040 }
 0x256   :  { %340 = vsyncpa [#allocation3], 1 }
 0x257   :  { %341 = vsyncpa [#allocation6], 1 }
 0x258   :  { %342 = vsyncpa [#allocation9], 1 }
 0x259   :  { %343 = vsyncpa [#allocation4], 1 }

</bundles_post_ra>
